<compile_context>
chip_gen: v6e
topology: v6e:2x2x1
jax: 0.10.0
libtpu: 0.0.40
codegen_flags: <defaults>
</compile_context>

<pallas_src>
import functools

import jax
import jax.numpy as jnp
from jax.experimental import pallas as pl
from jax.experimental.pallas import tpu as pltpu


def _round_up(a, m):
    return (a + m - 1) // m * m


def _valuenet_kernel(x_ref, w0_ref, b0_ref, w1_ref, b1_ref, w2_ref, b2_ref,
                     o_ref):
    # Layer 0 (packed): (block_rows, pack*D) @ (pack*D, pack*H0), f32 accum.
    h = jnp.dot(x_ref[...], w0_ref[...], preferred_element_type=jnp.float32)
    h = jnp.maximum(h + b0_ref[...], 0.0)
    # Layer 1 (packed, block-diagonal): (block_rows, pack*H0) @ (pack*H0, pack*H1).
    h = jnp.dot(h.astype(w1_ref.dtype), w1_ref[...],
                preferred_element_type=jnp.float32)
    h = jnp.maximum(h + b1_ref[...], 0.0)
    # Value head (packed, block-diagonal): (block_rows, pack*H1) @ (pack*H1, pack).
    v = jnp.dot(h.astype(w2_ref.dtype), w2_ref[...],
                preferred_element_type=jnp.float32)
    # b2 is a scalar in SMEM.
    o_ref[...] = (v + b2_ref[0]).astype(o_ref.dtype)


def prepare_value_net_params(params, compute_dtype=jnp.bfloat16, pack=4):
    """One-time weight prep (outside the per-call jit path).

    Builds block-diagonal weights so `pack` batch rows share one MXU row.
    Matmul weights are cast to `compute_dtype` (bf16 by default; pass
    jnp.float32 as an accuracy escape hatch); biases stay f32.
    """
    eye = jnp.eye(pack, dtype=jnp.float32)
    w0 = params["w0"].astype(jnp.float32)
    w1 = params["w1"].astype(jnp.float32)
    w2 = params["w2"].astype(jnp.float32).reshape(params["w0"].shape[1] and
                                                  params["w2"].shape[0], -1)
    return {
        "w0bd": jnp.kron(eye, w0).astype(compute_dtype),          # (pack*D, pack*H0)
        "b0t": jnp.tile(params["b0"].astype(jnp.float32), pack).reshape(1, -1),
        "w1bd": jnp.kron(eye, w1).astype(compute_dtype),          # (pack*H0, pack*H1)
        "b1t": jnp.tile(params["b1"].astype(jnp.float32), pack).reshape(1, -1),
        "w2bd": jnp.kron(eye, w2).astype(compute_dtype),          # (pack*H1, pack)
        "b2": params["b2"].astype(jnp.float32).reshape(-1)[:1],   # (1,) scalar, SMEM
    }


@functools.partial(jax.jit, static_argnames=("block_b",))
def value_net_forward(x, prepared, block_b=2048):
    """x: (B, num_inputs) float32. prepared: output of prepare_value_net_params.

    block_b is the max batch rows per grid step (sweep 2048-8192 on v6e/v7x;
    keep ~1024-2048 on v5e).
    """
    w0bd, b0t = prepared["w0bd"], prepared["b0t"]
    w1bd, b1t = prepared["w1bd"], prepared["b1t"]
    w2bd, b2 = prepared["w2bd"], prepared["b2"]

    B, D = x.shape
    pack = w2bd.shape[1]
    Dp = w0bd.shape[0]      # pack * D
    H0p = w0bd.shape[1]     # pack * H0
    H1p = w1bd.shape[1]     # pack * H1
    assert Dp == pack * D, (Dp, pack, D)

    # --- balanced tile selection ---------------------------------------
    nb = -(-B // max(int(block_b), 1))          # number of grid steps
    if nb == 1 and B >= 512:
        nb = 2                                  # keep both v7x TensorCores busy
    rows = -(-B // nb)                          # batch rows per step (pre-round)
    # block_rows must be a multiple of 16 (bf16 sublane tile) => block_eff % (16*pack) == 0.
    block_eff = _round_up(max(rows, pack), 16 * pack)
    B_pad = nb * block_eff
    block_rows = block_eff // pack

    # Stream x in the matmul weight dtype; pad; pack 4 rows per MXU row (free,
    # row-major reshape).
    x = x.astype(w0bd.dtype)
    if B_pad != B:
        x = jnp.pad(x, ((0, B_pad - B), (0, 0)))
    xp = x.reshape(B_pad // pack, Dp)

    out = pl.pallas_call(
        _valuenet_kernel,
        out_shape=jax.ShapeDtypeStruct((B_pad // pack, pack), jnp.float32),
        grid_spec=pltpu.PrefetchScalarGridSpec(
            num_scalar_prefetch=0,
            grid=(nb,),
            in_specs=[
                pl.BlockSpec((block_rows, Dp), lambda i: (i, 0)),   # packed x tile
                pl.BlockSpec((Dp, H0p), lambda i: (0, 0)),          # block-diag W0
                pl.BlockSpec((1, H0p), lambda i: (0, 0)),           # tiled b0 (f32)
                pl.BlockSpec((H0p, H1p), lambda i: (0, 0)),         # block-diag W1
                pl.BlockSpec((1, H1p), lambda i: (0, 0)),           # tiled b1 (f32)
                pl.BlockSpec((H1p, pack), lambda i: (0, 0)),        # block-diag head
                pl.BlockSpec(memory_space=pltpu.MemorySpace.SMEM),  # b2 scalar
            ],
            out_specs=pl.BlockSpec((block_rows, pack), lambda i: (i, 0)),
        ),
        compiler_params=pltpu.CompilerParams(
            dimension_semantics=("parallel",)),
    )(xp, w0bd, b0t, w1bd, b1t, w2bd, b2)

    # (B_pad/4, 4) -> (B_pad, 1) is a free row-major reshape in batch order;
    # padded rows (garbage through biases/ReLU, no NaN source) are dropped.
    return out.reshape(B_pad, 1)[:B]


def init_value_net_params(key, num_inputs, hidden_layer=(64, 64)):
    """Deterministic synthetic init (PyTorch-Linear-style uniform bounds)."""
    dims = [num_inputs] + list(hidden_layer) + [1]
    params = {}
    names = ["0", "1", "2"]
    for n, (din, dout) in zip(names, zip(dims[:-1], dims[1:])):
        key, kw, kb = jax.random.split(key, 3)
        bound = 1.0 / (din ** 0.5)
        params[f"w{n}"] = jax.random.uniform(
            kw, (din, dout), jnp.float32, -bound, bound)
        params[f"b{n}"] = jax.random.uniform(
            kb, (dout,), jnp.float32, -bound, bound)
    return params


def _reference_f32(x, params):
    h = jnp.maximum(x @ params["w0"] + params["b0"], 0.0)
    h = jnp.maximum(h @ params["w1"] + params["b1"], 0.0)
    return h @ params["w2"] + params["b2"]


def _reference_matched(x, params, compute_dtype=jnp.bfloat16):
    """Reference mirroring the kernel's bf16-quantized / f32-accumulate math."""
    up = lambda a: a.astype(compute_dtype).astype(jnp.float32)
    h = jnp.maximum(up(x) @ up(params["w0"]) + params["b0"], 0.0)
    h = jnp.maximum(up(h) @ up(params["w1"]) + params["b1"], 0.0)
    return up(h) @ up(params["w2"]) + params["b2"]


if __name__ == "__main__":
    key = jax.random.PRNGKey(0)
    num_inputs = 32
    hidden = (64, 64)

    kp, kx1, kx2, kx3 = jax.random.split(key, 4)
    params = init_value_net_params(kp, num_inputs, hidden_layer=hidden)
    prepared = prepare_value_net_params(params)

    # 1) Tiny ragged batch (single grid step, padding + 4-row packing).
    x_small = jax.random.normal(kx1, (5, num_inputs), jnp.float32)
    v_small = jax.block_until_ready(value_net_forward(x_small, prepared))
    assert v_small.shape == (5, 1), v_small.shape
    ref_m = _reference_matched(x_small, params)
    ref_f = _reference_f32(x_small, params)
    assert jnp.allclose(v_small, ref_m, atol=1e-3, rtol=1e-3), (
        float(jnp.max(jnp.abs(v_small - ref_m))))
    assert jnp.allclose(v_small, ref_f, atol=5e-2, rtol=5e-2), (
        float(jnp.max(jnp.abs(v_small - ref_f))))

    # 2) Ragged batch with explicit small block: multi-step grid + padding.
    x_mid = jax.random.normal(kx2, (500, num_inputs), jnp.float32)
    v_mid = jax.block_until_ready(value_net_forward(x_mid, prepared, block_b=256))
    assert v_mid.shape == (500, 1), v_mid.shape
    ref_m = _reference_matched(x_mid, params)
    ref_f = _reference_f32(x_mid, params)
    assert jnp.allclose(v_mid, ref_m, atol=1e-3, rtol=1e-3), (
        float(jnp.max(jnp.abs(v_mid - ref_m))))
    assert jnp.allclose(v_mid, ref_f, atol=5e-2, rtol=5e-2), (
        float(jnp.max(jnp.abs(v_mid - ref_f))))

    # 3) Mid-size batch, default block_b: exercises the forced >=2-step split
    #    (v7x dual-TensorCore occupancy) with balanced tiles.
    x_big = jax.random.normal(kx3, (600, num_inputs), jnp.float32)
    v_big = jax.block_until_ready(value_net_forward(x_big, prepared))
    assert v_big.shape == (600, 1), v_big.shape
    ref_m = _reference_matched(x_big, params)
    ref_f = _reference_f32(x_big, params)
    assert jnp.allclose(v_big, ref_m, atol=1e-3, rtol=1e-3), (
        float(jnp.max(jnp.abs(v_big - ref_m))))
    assert jnp.allclose(v_big, ref_f, atol=5e-2, rtol=5e-2), (
        float(jnp.max(jnp.abs(v_big - ref_f))))

    # 4) f32 escape hatch (no input/weight quantization).
    prepared_f32 = prepare_value_net_params(params, compute_dtype=jnp.float32)
    v_f32 = jax.block_until_ready(value_net_forward(x_small, prepared_f32))
    ref_f = _reference_f32(x_small, params)
    assert jnp.allclose(v_f32, ref_f, atol=5e-2, rtol=5e-2), (
        float(jnp.max(jnp.abs(v_f32 - ref_f))))

    print("KERNEL_OK")
</pallas_src>

<mosaic_0001>
module attributes {stable_mosaic.version = 11 : i64} {
  func.func @_valuenet_kernel(%arg0: i32, %arg1: memref<16x128xbf16, #tpu.memory_space<vmem>>, %arg2: memref<128x256xbf16, #tpu.memory_space<vmem>>, %arg3: memref<1x256xf32, #tpu.memory_space<vmem>>, %arg4: memref<256x256xbf16, #tpu.memory_space<vmem>>, %arg5: memref<1x256xf32, #tpu.memory_space<vmem>>, %arg6: memref<256x4xbf16, #tpu.memory_space<vmem>>, %arg7: memref<1xf32, #tpu.memory_space<smem>>, %arg8: memref<16x4xf32, #tpu.memory_space<vmem>>) attributes {dimension_semantics = [#tpu.dimension_semantics<parallel>], iteration_bounds = array<i64: 1>, scalar_prefetch = 0 : i64, scratch_operands = 0 : i64, tpu.core_type = #tpu.core_type<tc>, window_params = [{transform_indices = @transform_0, window_bounds = array<i64: 16, 128>}, {pipeline_mode = #tpu.pipeline_mode<synchronous>, transform_indices = @transform_1, window_bounds = array<i64: 128, 256>}, {pipeline_mode = #tpu.pipeline_mode<synchronous>, transform_indices = @transform_2, window_bounds = array<i64: 1, 256>}, {pipeline_mode = #tpu.pipeline_mode<synchronous>, transform_indices = @transform_3, window_bounds = array<i64: 256, 256>}, {pipeline_mode = #tpu.pipeline_mode<synchronous>, transform_indices = @transform_4, window_bounds = array<i64: 1, 256>}, {pipeline_mode = #tpu.pipeline_mode<synchronous>, transform_indices = @transform_5, window_bounds = array<i64: 256, 4>}, {transform_indices = @transform_6, window_bounds = array<i64: 1>}, {transform_indices = @transform_7, window_bounds = array<i64: 16, 4>}]} {
    %c0 = arith.constant 0 : index
    %c0_0 = arith.constant 0 : index
    %0 = vector.load %arg1[%c0, %c0_0] : memref<16x128xbf16, #tpu.memory_space<vmem>>, vector<16x128xbf16>
    %c0_1 = arith.constant 0 : index
    %c0_2 = arith.constant 0 : index
    %1 = vector.load %arg2[%c0_1, %c0_2] : memref<128x256xbf16, #tpu.memory_space<vmem>>, vector<128x256xbf16>
    %cst = arith.constant dense<0.000000e+00> : vector<16x256xf32>
    %2 = tpu.matmul %0, %1, %cst {dimension_numbers = #tpu.dot_dimension_numbers<[1], [0], [0], [1], [0, 0, 1, 1], [], []>} : vector<16x128xbf16>, vector<128x256xbf16>, vector<16x256xf32> -> vector<16x256xf32>
    %c0_3 = arith.constant 0 : index
    %c0_4 = arith.constant 0 : index
    %3 = vector.load %arg3[%c0_3, %c0_4] : memref<1x256xf32, #tpu.memory_space<vmem>>, vector<1x256xf32>
    %4 = vector.broadcast %3 : vector<1x256xf32> to vector<16x256xf32>
    %5 = arith.addf %2, %4 : vector<16x256xf32>
    %cst_5 = arith.constant 0.000000e+00 : f32
    %6 = vector.broadcast %cst_5 : f32 to vector<16x256xf32>
    %7 = arith.maximumf %5, %6 : vector<16x256xf32>
    %8 = arith.truncf %7 : vector<16x256xf32> to vector<16x256xbf16>
    %c0_6 = arith.constant 0 : index
    %c0_7 = arith.constant 0 : index
    %9 = vector.load %arg4[%c0_6, %c0_7] : memref<256x256xbf16, #tpu.memory_space<vmem>>, vector<256x256xbf16>
    %cst_8 = arith.constant dense<0.000000e+00> : vector<16x256xf32>
    %10 = tpu.matmul %8, %9, %cst_8 {dimension_numbers = #tpu.dot_dimension_numbers<[1], [0], [0], [1], [0, 0, 1, 1], [], []>} : vector<16x256xbf16>, vector<256x256xbf16>, vector<16x256xf32> -> vector<16x256xf32>
    %c0_9 = arith.constant 0 : index
    %c0_10 = arith.constant 0 : index
    %11 = vector.load %arg5[%c0_9, %c0_10] : memref<1x256xf32, #tpu.memory_space<vmem>>, vector<1x256xf32>
    %12 = vector.broadcast %11 : vector<1x256xf32> to vector<16x256xf32>
    %13 = arith.addf %10, %12 : vector<16x256xf32>
    %cst_11 = arith.constant 0.000000e+00 : f32
    %14 = vector.broadcast %cst_11 : f32 to vector<16x256xf32>
    %15 = arith.maximumf %13, %14 : vector<16x256xf32>
    %16 = arith.truncf %15 : vector<16x256xf32> to vector<16x256xbf16>
    %c0_12 = arith.constant 0 : index
    %c0_13 = arith.constant 0 : index
    %17 = vector.load %arg6[%c0_12, %c0_13] : memref<256x4xbf16, #tpu.memory_space<vmem>>, vector<256x4xbf16>
    %cst_14 = arith.constant dense<0.000000e+00> : vector<16x4xf32>
    %18 = tpu.matmul %16, %17, %cst_14 {dimension_numbers = #tpu.dot_dimension_numbers<[1], [0], [0], [1], [0, 0, 1, 1], [], []>} : vector<16x256xbf16>, vector<256x4xbf16>, vector<16x4xf32> -> vector<16x4xf32>
    %c0_15 = arith.constant 0 : index
    %19 = memref.load %arg7[%c0_15] : memref<1xf32, #tpu.memory_space<smem>>
    %20 = vector.broadcast %19 : f32 to vector<16x4xf32>
    %21 = arith.addf %18, %20 : vector<16x4xf32>
    %c0_16 = arith.constant 0 : index
    %c0_17 = arith.constant 0 : index
    %22 = vector.load %arg8[%c0_16, %c0_17] : memref<16x4xf32, #tpu.memory_space<vmem>>, vector<16x4xf32>
    tpu.vector_store %arg8[%c0_16, %c0_17], %21 {strides = array<i32>} : memref<16x4xf32, #tpu.memory_space<vmem>>, vector<16x4xf32>,
    return
  }
  func.func @transform_0(%arg0: i32) -> (i32, i32) {
    %c0_i32 = arith.constant 0 : i32
    %c0_i32_0 = arith.constant 0 : i32
    return %arg0, %c0_i32 : i32, i32
  }
  func.func @transform_1(%arg0: i32) -> (i32, i32) {
    %c0_i32 = arith.constant 0 : i32
    %c0_i32_0 = arith.constant 0 : i32
    %c0_i32_1 = arith.constant 0 : i32
    return %c0_i32, %c0_i32_0 : i32, i32
  }
  func.func @transform_2(%arg0: i32) -> (i32, i32) {
    %c0_i32 = arith.constant 0 : i32
    %c0_i32_0 = arith.constant 0 : i32
    %c0_i32_1 = arith.constant 0 : i32
    return %c0_i32, %c0_i32_0 : i32, i32
  }
  func.func @transform_3(%arg0: i32) -> (i32, i32) {
    %c0_i32 = arith.constant 0 : i32
    %c0_i32_0 = arith.constant 0 : i32
    %c0_i32_1 = arith.constant 0 : i32
    return %c0_i32, %c0_i32_0 : i32, i32
  }
  func.func @transform_4(%arg0: i32) -> (i32, i32) {
    %c0_i32 = arith.constant 0 : i32
    %c0_i32_0 = arith.constant 0 : i32
    %c0_i32_1 = arith.constant 0 : i32
    return %c0_i32, %c0_i32_0 : i32, i32
  }
  func.func @transform_5(%arg0: i32) -> (i32, i32) {
    %c0_i32 = arith.constant 0 : i32
    %c0_i32_0 = arith.constant 0 : i32
    %c0_i32_1 = arith.constant 0 : i32
    return %c0_i32, %c0_i32_0 : i32, i32
  }
  func.func @transform_6(%arg0: i32) -> i32 {
    %c0_i32 = arith.constant 0 : i32
    %c0_i32_0 = arith.constant 0 : i32
    return %c0_i32 : i32
  }
  func.func @transform_7(%arg0: i32) -> (i32, i32) {
    %c0_i32 = arith.constant 0 : i32
    %c0_i32_0 = arith.constant 0 : i32
    return %arg0, %c0_i32 : i32, i32
  }
}

</mosaic_0001>

<bundles_post_ra>
// kernel: value_net_forward.1
= control target key start
LH: loop header
LB: loop body
LE: loop exit
PB: predicated region body
PF: predicated region fallthrough
CT: control target
= control target key end

     0   :  { %13 = vsyncpa [#allocation4], 0  ;;  %s841_s24 = smov [#allocation3]   ;;  %s1002_s0 = inlined_call_operand.vmem [shape: bf16[16,128], index: 0, kind: input, shape index: {}]   ;;  %s1003_s1 = inlined_call_operand.vmem [shape: bf16[128,256], index: 1, kind: input, shape index: {}]   ;;  %s1004_s2 = inlined_call_operand.vmem [shape: f32[1,256], index: 2, kind: input, shape index: {}]   ;;  %s1005_s3 = inlined_call_operand.hbm [shape: bf16[256,256], index: 3, kind: input, shape index: {}]   ;;  %s1006_s4 = inlined_call_operand.vmem [shape: f32[1,256], index: 4, kind: input, shape index: {}]   ;;  %s1007_s5 = inlined_call_operand.vmem [shape: bf16[256,4], index: 5, kind: input, shape index: {}]   ;;  %s1008_s6 = inlined_call_operand.<no memory space> [shape: f32[1], index: 6, kind: input, shape index: {}]   ;;  %s1009_s7 = inlined_call_operand.vmem [shape: f32[16,4], index: 7, kind: output, shape index: {}]  }
   0x1   :  { %s25_s25 = sshll.u32 %s841_s24, 4  ;;  %s26_s25 = int_to_ptr.vmem [resolvable:$true] %s25_s25 }
   0x2   :  { %s827_s26 = scalar_lea.vmem %s26_s25, 4096  ;;  %p832_p1 = scmp.lt.s32.totalorder %s26_s25, %s26_s25 }
   0x3   :  { %p828_p0 = scmp.ne.s32.totalorder %s26_s25, %s827_s26  ;;  %p833_p2 = scmp.lt.s32.totalorder %s827_s26, %s827_s26 }
   0x5   :  { %p834_p3 = por %p833_p2, %p832_p1 }
   0x7   :  { %p835_p4 = pnand %p834_p3, %p828_p0 }
   0x9   :  { %838 = shalt.err (!%p835_p4)
}
   0xa   :  { %s842_s27 = smov 128   ;;  %s843_s28 = smov 8  }
   0xb   :  { %31 = dma.hbm_to_vmem [thread:$0]  %s1005_s3, 4096, %s26_s25, [#allocation4], %s842_s27, %s842_s27, %s843_s28  }
   0xc   :  { %839 = dma.done.wait [#allocation4], 4096  }
   0xd   :  { %840 = vsyncadd [#allocation4], 4294963200  ;;  %v844_v0 = vmov 0   ;;  %v730_v1 = vld [vmem:[%s1003_s1 + $0x74] ss:$8 sps:$4 sm:$0xff]   ;;  %v754_v27 = vld [vmem:[%s1002_s0] sm:$0xff]   ;;  %v62_v60 = vlaneseq }
   0xe   :  { %190 = vmatprep.mubr.bf16.mxu0 %v844_v0  ;;  %v732_v2 = vld [vmem:[%s1003_s1 + $0x70] ss:$8 sps:$4 sm:$0xff]   ;;  %158 = vmatprep.subr.bf16.mxu0 %v730_v1  ;;  %v733_v3 = vld [vmem:[%s1003_s1 + $0x64] ss:$8 sps:$4 sm:$0xff]   ;;  %v735_v4 = vld [vmem:[%s1003_s1 + $0x60] ss:$8 sps:$4 sm:$0xff]  }
   0xf   :  { %159 = vmatpush1.bf16.msra.mxu0 %v732_v2  ;;  %v736_v5 = vld [vmem:[%s1003_s1 + $0x54] ss:$8 sps:$4 sm:$0xff]   ;;  %v738_v6 = vld [vmem:[%s1003_s1 + $0x50] ss:$8 sps:$4 sm:$0xff]   ;;  %v739_v7 = vld [vmem:[%s1003_s1 + $0x44] ss:$8 sps:$4 sm:$0xff]  }
  0x10   :  { %160 = vmatprep.subr.bf16.mxu0 %v733_v3  ;;  %v741_v8 = vld [vmem:[%s1003_s1 + $0x40] ss:$8 sps:$4 sm:$0xff]   ;;  %v742_v9 = vld [vmem:[%s1003_s1 + $0x34] ss:$8 sps:$4 sm:$0xff]   ;;  %v757_v11 = vld [vmem:[#allocation3 + $0x70] ss:$8 sps:$4 sm:$0xff]  }
  0x11   :  { %v755_v10 = vld [vmem:[#allocation3 + $0x74] ss:$8 sps:$4 sm:$0xff]   ;;  %v758_v12 = vld [vmem:[#allocation3 + $0x64] ss:$8 sps:$4 sm:$0xff]   ;;  %v744_v13 = vld [vmem:[%s1003_s1 + $0x30] ss:$8 sps:$4 sm:$0xff]  }
  0x12   :  { %411 = vmatprep.subr.bf16.mxu1 %v755_v10  ;;  %v760_v14 = vld [vmem:[#allocation3 + $0x60] ss:$8 sps:$4 sm:$0xff]   ;;  %v745_v15 = vld [vmem:[%s1003_s1 + $0x24] ss:$8 sps:$4 sm:$0xff]   ;;  %v761_v16 = vld [vmem:[#allocation3 + $0x54] ss:$8 sps:$4 sm:$0xff]  }
  0x13   :  { %161 = vmatpush1.bf16.msra.mxu0 %v735_v4  ;;  %412 = vmatpush1.bf16.msra.mxu1 %v757_v11  ;;  %v747_v17 = vld [vmem:[%s1003_s1 + $0x20] ss:$8 sps:$4 sm:$0xff]   ;;  %v763_v18 = vld [vmem:[#allocation3 + $0x50] ss:$8 sps:$4 sm:$0xff]   ;;  %v748_v19 = vld [vmem:[%s1003_s1 + $0x14] ss:$8 sps:$4 sm:$0xff]  }
  0x14   :  { %162 = vmatprep.subr.bf16.mxu0 %v736_v5  ;;  %413 = vmatprep.subr.bf16.mxu1 %v758_v12  ;;  %v764_v20 = vld [vmem:[#allocation3 + $0x44] ss:$8 sps:$4 sm:$0xff]   ;;  %v750_v21 = vld [vmem:[%s1003_s1 + $0x10] ss:$8 sps:$4 sm:$0xff]   ;;  %v766_v22 = vld [vmem:[#allocation3 + $0x40] ss:$8 sps:$4 sm:$0xff]  }
  0x15   :  { %v751_v23 = vld [vmem:[%s1003_s1 + $0x4] ss:$8 sps:$4 sm:$0xff]   ;;  %v767_v24 = vld [vmem:[#allocation3 + $0x34] ss:$8 sps:$4 sm:$0xff]   ;;  %v753_v25 = vld [vmem:[%s1003_s1] ss:$8 sps:$4 sm:$0xff]  }
  0x16   :  { %v769_v26 = vld [vmem:[#allocation3 + $0x30] ss:$8 sps:$4 sm:$0xff]   ;;  %v770_v28 = vld [vmem:[#allocation3 + $0x24] ss:$8 sps:$4 sm:$0xff]   ;;  %v772_v29 = vld [vmem:[#allocation3 + $0x20] ss:$8 sps:$4 sm:$0xff]  }
  0x17   :  { %163 = vmatpush1.bf16.msra.mxu0 %v738_v6  ;;  %414 = vmatpush1.bf16.msra.mxu1 %v760_v14  ;;  %v773_v30 = vld [vmem:[#allocation3 + $0x14] ss:$8 sps:$4 sm:$0xff]   ;;  %v775_v31 = vld [vmem:[#allocation3 + $0x10] ss:$8 sps:$4 sm:$0xff]   ;;  %v776_v32 = vld [vmem:[#allocation3 + $0x4] ss:$8 sps:$4 sm:$0xff]  }
  0x18   :  { %164 = vmatprep.subr.bf16.mxu0 %v739_v7  ;;  %415 = vmatprep.subr.bf16.mxu1 %v761_v16  ;;  %v778_v33 = vld [vmem:[#allocation3] ss:$8 sps:$4 sm:$0xff]   ;;  %v779_v34 = vld [vmem:[#allocation3 + $0xf4] ss:$8 sps:$4 sm:$0xff]   ;;  %v781_v35 = vld [vmem:[#allocation3 + $0xf0] ss:$8 sps:$4 sm:$0xff]  }
  0x19   :  { %v782_v36 = vld [vmem:[#allocation3 + $0xe4] ss:$8 sps:$4 sm:$0xff]   ;;  %v784_v37 = vld [vmem:[#allocation3 + $0xe0] ss:$8 sps:$4 sm:$0xff]   ;;  %v785_v38 = vld [vmem:[#allocation3 + $0xd4] ss:$8 sps:$4 sm:$0xff]  }
  0x1a   :  { %v787_v39 = vld [vmem:[#allocation3 + $0xd0] ss:$8 sps:$4 sm:$0xff]   ;;  %v788_v40 = vld [vmem:[#allocation3 + $0xc4] ss:$8 sps:$4 sm:$0xff]   ;;  %v790_v41 = vld [vmem:[#allocation3 + $0xc0] ss:$8 sps:$4 sm:$0xff]  }
  0x1b   :  { %165 = vmatpush1.bf16.msra.mxu0 %v741_v8  ;;  %416 = vmatpush1.bf16.msra.mxu1 %v763_v18  ;;  %v791_v42 = vld [vmem:[#allocation3 + $0xb4] ss:$8 sps:$4 sm:$0xff]   ;;  %v793_v43 = vld [vmem:[#allocation3 + $0xb0] ss:$8 sps:$4 sm:$0xff]   ;;  %v794_v44 = vld [vmem:[#allocation3 + $0xa4] ss:$8 sps:$4 sm:$0xff]  }
  0x1c   :  { %166 = vmatprep.subr.bf16.mxu0 %v742_v9  ;;  %417 = vmatprep.subr.bf16.mxu1 %v764_v20  ;;  %v796_v45 = vld [vmem:[#allocation3 + $0xa0] ss:$8 sps:$4 sm:$0xff]   ;;  %v797_v46 = vld [vmem:[#allocation3 + $0x94] ss:$8 sps:$4 sm:$0xff]   ;;  %v799_v47 = vld [vmem:[#allocation3 + $0x90] ss:$8 sps:$4 sm:$0xff]  }
  0x1d   :  { %v800_v48 = vld [vmem:[#allocation3 + $0x84] ss:$8 sps:$4 sm:$0xff]   ;;  %v802_v49 = vld [vmem:[#allocation3 + $0x80] ss:$8 sps:$4 sm:$0xff]   ;;  %v803_v50 = vld [vmem:[%s1007_s5 + $0x78] sm:$0xff]   ;;  %v63_v61 = vshrl.u32 %v62_v60, 7 }
  0x1e   :  { %v804_v51 = vld [vmem:[%s1007_s5 + $0x38] sm:$0xff]   ;;  %v805_v52 = vld [vmem:[%s1007_s5 + $0x70] sm:$0xff]   ;;  %v807_v54 = vld [vmem:[%s1007_s5 + $0x68] sm:$0xff]   ;;  %vm631_vm0 = vcmask 31744  }
  0x1f   :  { %167 = vmatpush1.bf16.msra.mxu0 %v744_v13  ;;  %418 = vmatpush1.bf16.msra.mxu1 %v766_v22  ;;  %v806_v53 = vld [vmem:[%s1007_s5 + $0x30] sm:$0xff]   ;;  %v808_v55 = vld [vmem:[%s1007_s5 + $0x28] sm:$0xff]   ;;  %v809_v56 = vld [vmem:[%s1007_s5 + $0x60] sm:$0xff]   ;;  %v68_v62 = vsub.s32 1, %v63_v61  ;;  %v64_v63 = vsub.s32 0, %v63_v61 }
  0x20   :  { %168 = vmatprep.subr.bf16.mxu0 %v745_v15  ;;  %419 = vmatprep.subr.bf16.mxu1 %v767_v24  ;;  %v810_v57 = vld [vmem:[%s1007_s5 + $0x20] sm:$0xff]   ;;  %v811_v58 = vld [vmem:[%s1007_s5 + $0x58] sm:$0xff]   ;;  %v814_v18 = vld [vmem:[%s1007_s5 + $0x10] sm:$0xff]  }
  0x21   :  { %v812_v59 = vld [vmem:[%s1007_s5 + $0x18] sm:$0xff]   ;;  %v60_v0 = vld [vmem:[%s1004_s2] sm:$0x3]  ;;  %v816_v20 = vld [vmem:[%s1007_s5 + $0x8] sm:$0xff]  }
  0x22   :  { %v69_v2 = vrot.slane %v60_v0, %v68_v62  ;;  %v65_v3 = vrot.slane %v60_v0, %v64_v63  ;;  %v818_v22 = vld [vmem:[%s1007_s5] sm:$0xff]  }
  0x23   :  { %169 = vmatpush1.bf16.msra.mxu0 %v747_v17  ;;  %420 = vmatpush1.bf16.msra.mxu1 %v769_v26  ;;  %v813_v17 = vld [vmem:[%s1007_s5 + $0x50] sm:$0xff]  }
  0x24   :  { %170 = vmatprep.subr.bf16.mxu0 %v748_v19  ;;  %421 = vmatprep.subr.bf16.mxu1 %v770_v28  ;;  %v815_v19 = vld [vmem:[%s1007_s5 + $0x48] sm:$0xff]  }
  0x27   :  { %171 = vmatpush1.bf16.msra.mxu0 %v750_v21  ;;  %422 = vmatpush1.bf16.msra.mxu1 %v772_v29  ;;  %v817_v21 = vld [vmem:[%s1007_s5 + $0x40] sm:$0xff]  }
  0x28   :  { %172 = vmatprep.subr.bf16.mxu0 %v751_v23  ;;  %423 = vmatprep.subr.bf16.mxu1 %v773_v30  ;;  %v239_v23 = vld [vmem:[%s1006_s4] sm:$0x3] }
  0x29   :  { %v244_v26 = vrot.slane %v239_v23, %v64_v63 }
  0x2b   :  { %173 = vmatpush1.bf16.msra.mxu0 %v753_v25  ;;  %424 = vmatpush1.bf16.msra.mxu1 %v775_v31  ;;  %v248_v25 = vrot.slane %v239_v23, %v68_v62 }
  0x2c   :  { %425 = vmatprep.subr.bf16.mxu1 %v776_v32  ;;  %704 = vmatprep.subr.bf16.mxu0 %v803_v50 }
  0x2e   :  { %191 = vmatmul.mubr.bf16.vlgmr.msra.gmra.mxu0 %v754_v27 }
  0x2f   :  { %426 = vmatpush1.bf16.msra.mxu1 %v778_v33  ;;  %705 = vmatpush3.bf16.msra.mxu0 %v804_v51 }
  0x30   :  { %427 = vmatprep.subr.bf16.mxu1 %v779_v34  ;;  %706 = vmatprep.subr.bf16.mxu0 %v805_v52 }
  0x33   :  { %428 = vmatpush2.bf16.msra.mxu1 %v781_v35  ;;  %707 = vmatpush3.bf16.msra.mxu0 %v806_v53 }
  0x34   :  { %429 = vmatprep.subr.bf16.mxu1 %v782_v36  ;;  %708 = vmatprep.subr.bf16.mxu0 %v807_v54 }
  0x37   :  { %430 = vmatpush2.bf16.msra.mxu1 %v784_v37  ;;  %709 = vmatpush3.bf16.msra.mxu0 %v808_v55 }
  0x38   :  { %431 = vmatprep.subr.bf16.mxu1 %v785_v38  ;;  %710 = vmatprep.subr.bf16.mxu0 %v809_v56 }
  0x3b   :  { %432 = vmatpush2.bf16.msra.mxu1 %v787_v39  ;;  %711 = vmatpush3.bf16.msra.mxu0 %v810_v57 }
  0x3c   :  { %433 = vmatprep.subr.bf16.mxu1 %v788_v40  ;;  %712 = vmatprep.subr.bf16.mxu0 %v811_v58 }
  0x3f   :  { %434 = vmatpush2.bf16.msra.mxu1 %v790_v41  ;;  %713 = vmatpush3.bf16.msra.mxu0 %v812_v59  ;;  %v493_v41 = vstv %s1008_s6 }
  0x40   :  { %435 = vmatprep.subr.bf16.mxu1 %v791_v42  ;;  %714 = vmatprep.subr.bf16.mxu0 %v813_v17 }
  0x43   :  { %436 = vmatpush2.bf16.msra.mxu1 %v793_v43  ;;  %715 = vmatpush3.bf16.msra.mxu0 %v814_v18 }
  0x44   :  { %437 = vmatprep.subr.bf16.mxu1 %v794_v44  ;;  %716 = vmatprep.subr.bf16.mxu0 %v815_v19 }
  0x47   :  { %438 = vmatpush2.bf16.msra.mxu1 %v796_v45  ;;  %717 = vmatpush3.bf16.msra.mxu0 %v816_v20 }
  0x48   :  { %439 = vmatprep.subr.bf16.mxu1 %v797_v46  ;;  %718 = vmatprep.subr.bf16.mxu0 %v817_v21 }
  0x4b   :  { %440 = vmatpush2.bf16.msra.mxu1 %v799_v47  ;;  %719 = vmatpush3.bf16.msra.mxu0 %v818_v22 }
  0x4c   :  { %441 = vmatprep.subr.bf16.mxu1 %v800_v48 }
  0x4f   :  { %442 = vmatpush2.bf16.msra.mxu1 %v802_v49 }
  0xee   :  { %v192_v1 = vpop.f32.mrf.mxu0 }
  0xef   :  { %v193_v8 = vadd.f32 %v192_v1, %v65_v3 }
  0xf0   :  { %v194_v4 = vpop.f32.mrf.mxu0 }
  0xf1   :  { %v195_v6 = vadd.f32 %v194_v4, %v69_v2  ;;  %v201_v14 = vmax.f32 %v193_v8, 0.0 }
  0xf2   :  { %v196_v5 = vpop.f32.mrf.mxu0 }
  0xf3   :  { %v197_v7 = vadd.f32 %v196_v5, %v65_v3  ;;  %v202_v12 = vmax.f32 %v195_v6, 0.0 }
  0xf4   :  { %v198_v9 = vpop.f32.mrf.mxu0 }
  0xf5   :  { %v199_v10 = vadd.f32 %v198_v9, %v69_v2  ;;  %v203_v11 = vmax.f32 %v197_v7, 0.0 }
  0xf7   :  { %v204_v13 = vmax.f32 %v199_v10, 0.0  ;;  %v205_v16 = vpack.c.bf16 %v203_v11, %v201_v14 }
  0xf9   :  { %v206_v15 = vpack.c.bf16 %v204_v13, %v202_v12 }
  0xfb   :  { %443 = vmatprep.mubr.bf16.mxu1 %v206_v15 }
  0xfc   :  { %444 = vmatmul.mubr.bf16.vlgmr.msra.gmra.mxu1 %v205_v16 }
 0x1bc   :  { %v445_v24 = vpop.f32.mrf.mxu1 }
 0x1bd   :  { %v446_v31 = vadd.f32 %v445_v24, %v244_v26 }
 0x1be   :  { %v447_v27 = vpop.f32.mrf.mxu1 }
 0x1bf   :  { %v448_v29 = vadd.f32 %v447_v27, %v248_v25  ;;  %v454_v37 = vmax.f32 %v446_v31, 0.0 }
 0x1c0   :  { %v449_v28 = vpop.f32.mrf.mxu1 }
 0x1c1   :  { %v450_v30 = vadd.f32 %v449_v28, %v244_v26  ;;  %v455_v35 = vmax.f32 %v448_v29, 0.0 }
 0x1c2   :  { %v451_v32 = vpop.f32.mrf.mxu1 }
 0x1c3   :  { %v452_v33 = vadd.f32 %v451_v32, %v248_v25  ;;  %v456_v34 = vmax.f32 %v450_v30, 0.0 }
 0x1c5   :  { %v457_v36 = vmax.f32 %v452_v33, 0.0  ;;  %v458_v39 = vpack.c.bf16 %v456_v34, %v454_v37 }
 0x1c7   :  { %v459_v38 = vpack.c.bf16 %v457_v36, %v455_v35 }
 0x1c9   :  { %622 = vmatprep.mubr.bf16.mxu0 %v459_v38 }
 0x1ca   :  { %623 = vmatmul.mubr.bf16.vlgmr.msra.gmra.mxu0 %v458_v39 }
 0x28a   :  { %v720_v40 = vpop.f32.mrf.mxu0 }
 0x28c   :  { %v721_v42 = vpop.f32.mrf.mxu0 }
 0x28d   :  { %v722_v43 = vadd.f32 %v721_v42, %v720_v40 }
 0x28e   :  { %v723_v44 = vpop.f32.mrf.mxu0 }
 0x28f   :  { %v625_v45 = vadd.f32 %v722_v43, %v493_v41 }
 0x290   :  { %v724_v46 = vpop.f32.mrf.mxu0 }
 0x291   :  { %632 = vst.msk [vmem:[%s1009_s7] sm:$0xff] %vm631_vm0, %v625_v45  ;;  %v725_v47 = vadd.f32 %v724_v46, %v723_v44 }
 0x293   :  { %v628_v48 = vadd.f32 %v725_v47, %v493_v41 }
 0x295   :  { %633 = vst.msk [vmem:[%s1009_s7 + $0x8] sm:$0xff] %vm631_vm0, %v628_v48 }
 0x296   :  { %638 = vsyncpa [#allocation4], 1 }

</bundles_post_ra>
